<compile_context>
chip_gen: v7x
topology: tpu7x:2x2x1
jax: 0.10.0
libtpu: 0.0.40
codegen_flags: <defaults>
</compile_context>

<pallas_src>
import functools
import math

import jax
import jax.numpy as jnp
from jax.experimental import pallas as pl
from jax.experimental.pallas import tpu as pltpu


# ---------------------------------------------------------------------------
# Helpers
# ---------------------------------------------------------------------------
_SQRT_2_OVER_PI = math.sqrt(2.0 / math.pi)


def _gelu(x):
    # tanh-form GELU: the tanh goes to the EUP slot, leaving the VALU free.
    x = x.astype(jnp.float32)
    return 0.5 * x * (1.0 + jnp.tanh(_SQRT_2_OVER_PI * (x + 0.044715 * x * x * x)))


def _round_up(v, m):
    return ((v + m - 1) // m) * m


def _bn_affine(gamma, beta, mean, var, eps=1e-5):
    scale = gamma / jnp.sqrt(var + eps)
    shift = beta - mean * scale
    return scale, shift


# ---------------------------------------------------------------------------
# Branch A: in_features != 768 (conv MLP).
# Grid = (batch, hidden-channel tiles).  Each step: fc1 tile -> bn1 -> GELU ->
# depthwise 3x3 on that channel tile -> bn2 -> GELU -> fc2 partial matmul
# accumulated into an f32 scratch; bn3 + store on the last channel tile.
# ---------------------------------------------------------------------------
def _conv_mlp_kernel(x_ref, w1_ref, s1_ref, t1_ref,
                     dw_ref, s2_ref, t2_ref,
                     w2_ref, s3_ref, t3_ref,
                     o_ref, pad_ref, acc_ref, *, H, W):
    c = pl.program_id(1)
    n_ct = pl.num_programs(1)
    TCH = w1_ref.shape[1]

    @pl.when(c == 0)
    def _init():
        # Zero only the 1-pixel halo ring of the padded depthwise scratch; the
        # interior is fully overwritten every step.
        pad_ref[0:1, :, :] = jnp.zeros((1, W + 2, TCH), jnp.float32)
        pad_ref[H + 1:H + 2, :, :] = jnp.zeros((1, W + 2, TCH), jnp.float32)
        pad_ref[:, 0:1, :] = jnp.zeros((H + 2, 1, TCH), jnp.float32)
        pad_ref[:, W + 1:W + 2, :] = jnp.zeros((H + 2, 1, TCH), jnp.float32)
        acc_ref[...] = jnp.zeros_like(acc_ref)

    # fc1: 1x1 conv == per-pixel matmul (bf16 in / f32 accumulate on the MXU),
    # then bn1 (conv bias folded into the shift) + GELU.
    h = jnp.dot(x_ref[0], w1_ref[...], preferred_element_type=jnp.float32)
    h = _gelu(h * s1_ref[...] + t1_ref[...])

    # depthwise 3x3 conv, padding=1: stage into the zero-padded scratch and
    # accumulate the 9 statically-shifted taps (per-channel -> no cross-tile halo).
    pad_ref[1:H + 1, 1:W + 1, :] = h.reshape(H, W, TCH)
    dw = dw_ref[...]                                   # (3, 3, TCH)
    acc = jnp.zeros((H, W, TCH), jnp.float32)
    for dy in range(3):
        for dx in range(3):
            acc = acc + pad_ref[dy:dy + H, dx:dx + W, :] * dw[dy:dy + 1, dx:dx + 1, :]

    h2 = _gelu(acc.reshape(H * W, TCH) * s2_ref[...] + t2_ref[...])   # bn2 + GELU

    # fc2: 1x1 conv — accumulate this channel tile's contribution.
    acc_ref[...] += jnp.dot(h2.astype(jnp.bfloat16), w2_ref[...],
                            preferred_element_type=jnp.float32)

    @pl.when(c == n_ct - 1)
    def _finish():
        o_ref[0] = (acc_ref[...] * s3_ref[...] + t3_ref[...]).astype(o_ref.dtype)


def mlp_conv_forward(x, p):
    """x: (B, N, C) with N a perfect square (matches the PyTorch forward)."""
    B, N, C = x.shape
    H = W = int(math.isqrt(N))
    assert H * W == N
    Ch = p["w1"].shape[1]
    Co = p["w2"].shape[1]

    s1, t1 = _bn_affine(*p["bn1"])
    s2, t2 = _bn_affine(*p["bn2"])
    s3, t3 = _bn_affine(*p["bn3"])
    # Fold the conv biases into the BN shifts (done once, wrapper-side).
    t1 = t1 + p["b1"] * s1
    t2 = t2 + p["dwb"] * s2
    t3 = t3 + p["b2"] * s3

    # Tile the hidden (lane) dimension; pad it with zero channels so every
    # tile is a full 128 lanes.  Zero-padded channels contribute nothing.
    TCH = 128
    Ch_pad = _round_up(Ch, TCH)
    pc = Ch_pad - Ch
    w1 = jnp.pad(p["w1"], ((0, 0), (0, pc))).astype(jnp.bfloat16)
    dw = jnp.pad(p["dw"], ((0, 0), (0, 0), (0, pc))).astype(jnp.float32)
    w2 = jnp.pad(p["w2"], ((0, pc), (0, 0))).astype(jnp.bfloat16)
    s1 = jnp.pad(s1, (0, pc))[None, :]
    t1 = jnp.pad(t1, (0, pc))[None, :]
    s2 = jnp.pad(s2, (0, pc))[None, :]
    t2 = jnp.pad(t2, (0, pc))[None, :]
    s3 = s3[None, :]
    t3 = t3[None, :]

    x_bf = x.astype(jnp.bfloat16)
    n_ct = Ch_pad // TCH

    kernel = functools.partial(_conv_mlp_kernel, H=H, W=W)
    full2d = lambda b, c: (0, 0)
    out = pl.pallas_call(
        kernel,
        out_shape=jax.ShapeDtypeStruct((B, N, Co), x.dtype),
        grid_spec=pltpu.PrefetchScalarGridSpec(
            num_scalar_prefetch=0,
            grid=(B, n_ct),
            in_specs=[
                pl.BlockSpec((1, N, C), lambda b, c: (b, 0, 0)),    # x (bf16)
                pl.BlockSpec((C, TCH), lambda b, c: (0, c)),        # w1 tile
                pl.BlockSpec((1, TCH), lambda b, c: (0, c)),        # bn1 scale
                pl.BlockSpec((1, TCH), lambda b, c: (0, c)),        # bn1 shift (+b1)
                pl.BlockSpec((3, 3, TCH), lambda b, c: (0, 0, c)),  # dw tile
                pl.BlockSpec((1, TCH), lambda b, c: (0, c)),        # bn2 scale
                pl.BlockSpec((1, TCH), lambda b, c: (0, c)),        # bn2 shift (+dwb)
                pl.BlockSpec((TCH, Co), lambda b, c: (c, 0)),       # w2 tile
                pl.BlockSpec((1, Co), full2d),                      # bn3 scale
                pl.BlockSpec((1, Co), full2d),                      # bn3 shift (+b2)
            ],
            out_specs=pl.BlockSpec((1, N, Co), lambda b, c: (b, 0, 0)),
            scratch_shapes=[
                pltpu.VMEM((H + 2, W + 2, TCH), jnp.float32),   # padded dw input
                pltpu.VMEM((N, Co), jnp.float32),               # fc2 accumulator
            ],
        ),
        compiler_params=pltpu.CompilerParams(
            dimension_semantics=("parallel", "arbitrary")),
    )(x_bf, w1, s1, t1, dw, s2, t2, w2, s3, t3)

    return out


# ---------------------------------------------------------------------------
# Branch B: in_features == 768 (Linear -> GELU -> Linear), tiled over rows.
# ---------------------------------------------------------------------------
def _linear_mlp_kernel(x_ref, w1_ref, b1_ref, w2_ref, b2_ref, o_ref):
    # bf16 operands on the MXU, f32 accumulation, f32 bias/GELU.
    h = jnp.dot(x_ref[...], w1_ref[...], preferred_element_type=jnp.float32)
    h = _gelu(h + b1_ref[...])
    out = jnp.dot(h.astype(jnp.bfloat16), w2_ref[...],
                  preferred_element_type=jnp.float32) + b2_ref[...]
    o_ref[...] = out.astype(o_ref.dtype)


def mlp_linear_forward(x, p):
    """x: (..., 768); Linear over the last dim (dropout p=0 -> identity)."""
    Fi, Fh = p["w1"].shape
    Fo = p["w2"].shape[1]
    lead = x.shape[:-1]
    x2d = x.reshape(-1, Fi)
    M = x2d.shape[0]

    # Large, MXU-friendly row tile; pad M up to a multiple of TM and slice.
    TM = 256
    if M < TM:
        TM = max(8, _round_up(M, 8))
    M_pad = _round_up(M, TM)
    if M_pad != M:
        x2d = jnp.pad(x2d, ((0, M_pad - M), (0, 0)))

    x_bf = x2d.astype(jnp.bfloat16)
    w1 = p["w1"].astype(jnp.bfloat16)
    w2 = p["w2"].astype(jnp.bfloat16)
    b1 = p["b1"][None, :].astype(jnp.float32)
    b2 = p["b2"][None, :].astype(jnp.float32)

    out = pl.pallas_call(
        _linear_mlp_kernel,
        out_shape=jax.ShapeDtypeStruct((M_pad, Fo), x.dtype),
        grid_spec=pltpu.PrefetchScalarGridSpec(
            num_scalar_prefetch=0,
            grid=(M_pad // TM,),
            in_specs=[
                pl.BlockSpec((TM, Fi), lambda i: (i, 0)),
                pl.BlockSpec((Fi, Fh), lambda i: (0, 0)),
                pl.BlockSpec((1, Fh), lambda i: (0, 0)),
                pl.BlockSpec((Fh, Fo), lambda i: (0, 0)),
                pl.BlockSpec((1, Fo), lambda i: (0, 0)),
            ],
            out_specs=pl.BlockSpec((TM, Fo), lambda i: (i, 0)),
        ),
        compiler_params=pltpu.CompilerParams(dimension_semantics=("parallel",)),
    )(x_bf, w1, b1, w2, b2)

    out = out[:M]
    return out.reshape(lead + (Fo,))


# ---------------------------------------------------------------------------
# Deterministic synthetic parameter initialisation (shapes from __init__)
# ---------------------------------------------------------------------------
def init_conv_mlp_params(key, in_features, hidden_features=None, out_features=None):
    out_features = out_features or in_features
    hidden_features = hidden_features or in_features
    ks = jax.random.split(key, 9)
    f32 = jnp.float32
    nrm = lambda k, s, sc: sc * jax.random.normal(k, s, f32)

    def bn(k, c):
        k1, k2, k3, k4 = jax.random.split(k, 4)
        gamma = 1.0 + 0.1 * jax.random.normal(k1, (c,), f32)
        beta = 0.1 * jax.random.normal(k2, (c,), f32)
        mean = 0.1 * jax.random.normal(k3, (c,), f32)
        var = 1.0 + 0.1 * jax.random.uniform(k4, (c,), f32)
        return gamma, beta, mean, var

    return {
        "w1": nrm(ks[0], (in_features, hidden_features), 1.0 / math.sqrt(in_features)),
        "b1": nrm(ks[1], (hidden_features,), 0.02),
        "dw": nrm(ks[2], (3, 3, hidden_features), 1.0 / 3.0),
        "dwb": nrm(ks[3], (hidden_features,), 0.02),
        "w2": nrm(ks[4], (hidden_features, out_features), 1.0 / math.sqrt(hidden_features)),
        "b2": nrm(ks[5], (out_features,), 0.02),
        "bn1": bn(ks[6], hidden_features),
        "bn2": bn(ks[7], hidden_features),
        "bn3": bn(ks[8], out_features),
    }


def init_linear_mlp_params(key, in_features, hidden_features=None, out_features=None):
    out_features = out_features or in_features
    hidden_features = hidden_features or in_features
    ks = jax.random.split(key, 4)
    f32 = jnp.float32
    nrm = lambda k, s, sc: sc * jax.random.normal(k, s, f32)
    return {
        "w1": nrm(ks[0], (in_features, hidden_features), 1.0 / math.sqrt(in_features)),
        "b1": nrm(ks[1], (hidden_features,), 0.02),
        "w2": nrm(ks[2], (hidden_features, out_features), 1.0 / math.sqrt(hidden_features)),
        "b2": nrm(ks[3], (out_features,), 0.02),
    }


if __name__ == "__main__":
    key = jax.random.PRNGKey(0)
    k_xa, k_pa, k_xb, k_pb = jax.random.split(key, 4)

    # --- conv branch (in_features != 768): x is (B, N, C), N = H*W perfect square
    B, H, W, C, hidden = 2, 8, 8, 32, 64
    N = H * W
    x_conv = jax.random.normal(k_xa, (B, N, C), jnp.float32)
    p_conv = init_conv_mlp_params(k_pa, C, hidden_features=hidden)
    y_conv = jax.block_until_ready(mlp_conv_forward(x_conv, p_conv))
    assert y_conv.shape == (B, N, C)
    assert bool(jnp.all(jnp.isfinite(y_conv)))

    # --- linear branch (in_features == 768)
    S, F = 8, 768
    x_lin = jax.random.normal(k_xb, (B, S, F), jnp.float32)
    p_lin = init_linear_mlp_params(k_pb, F)
    y_lin = jax.block_until_ready(mlp_linear_forward(x_lin, p_lin))
    assert y_lin.shape == (B, S, F)
    assert bool(jnp.all(jnp.isfinite(y_lin)))

    print("KERNEL_OK")
</pallas_src>

<mosaic_0001>
module attributes {stable_mosaic.version = 11 : i64} {
  func.func @_conv_mlp_kernel(%arg0: i32, %arg1: i32, %arg2: memref<1x64x32xbf16, #tpu.memory_space<vmem>>, %arg3: memref<32x128xbf16, #tpu.memory_space<vmem>>, %arg4: memref<1x128xf32, #tpu.memory_space<vmem>>, %arg5: memref<1x128xf32, #tpu.memory_space<vmem>>, %arg6: memref<3x3x128xf32, #tpu.memory_space<vmem>>, %arg7: memref<1x128xf32, #tpu.memory_space<vmem>>, %arg8: memref<1x128xf32, #tpu.memory_space<vmem>>, %arg9: memref<128x32xbf16, #tpu.memory_space<vmem>>, %arg10: memref<1x32xf32, #tpu.memory_space<vmem>>, %arg11: memref<1x32xf32, #tpu.memory_space<vmem>>, %arg12: memref<1x64x32xf32, #tpu.memory_space<vmem>>, %arg13: memref<10x10x128xf32, #tpu.memory_space<vmem>>, %arg14: memref<64x32xf32, #tpu.memory_space<vmem>>) attributes {dimension_semantics = [#tpu.dimension_semantics<parallel>, #tpu.dimension_semantics<arbitrary>], iteration_bounds = array<i64: 2, 1>, scalar_prefetch = 0 : i64, scratch_operands = 2 : i64, tpu.core_type = #tpu.core_type<tc>, window_params = [{transform_indices = @transform_0, window_bounds = array<i64: 1, 64, 32>}, {transform_indices = @transform_1, window_bounds = array<i64: 32, 128>}, {transform_indices = @transform_2, window_bounds = array<i64: 1, 128>}, {transform_indices = @transform_3, window_bounds = array<i64: 1, 128>}, {transform_indices = @transform_4, window_bounds = array<i64: 3, 3, 128>}, {transform_indices = @transform_5, window_bounds = array<i64: 1, 128>}, {transform_indices = @transform_6, window_bounds = array<i64: 1, 128>}, {transform_indices = @transform_7, window_bounds = array<i64: 128, 32>}, {pipeline_mode = #tpu.pipeline_mode<synchronous>, transform_indices = @transform_8, window_bounds = array<i64: 1, 32>}, {pipeline_mode = #tpu.pipeline_mode<synchronous>, transform_indices = @transform_9, window_bounds = array<i64: 1, 32>}, {transform_indices = @transform_10, window_bounds = array<i64: 1, 64, 32>}]} {
    %c0_i32 = arith.constant 0 : i32
    %0 = arith.cmpi eq, %arg1, %c0_i32 : i32
    %1 = arith.extui %0 : i1 to i32
    %c0_i32_0 = arith.constant 0 : i32
    %2 = arith.cmpi ne, %1, %c0_i32_0 : i32
    scf.if %2 {
      %cst_62 = arith.constant 0.000000e+00 : f32
      %104 = vector.broadcast %cst_62 : f32 to vector<1x10x128xf32>
      %c0_63 = arith.constant 0 : index
      %c0_64 = arith.constant 0 : index
      %c0_65 = arith.constant 0 : index
      %105 = vector.load %arg13[%c0_63, %c0_64, %c0_65] : memref<10x10x128xf32, #tpu.memory_space<vmem>>, vector<1x10x128xf32>
      tpu.vector_store %arg13[%c0_63, %c0_64, %c0_65], %104 {strides = array<i32>} : memref<10x10x128xf32, #tpu.memory_space<vmem>>, vector<1x10x128xf32>,
      %cst_66 = arith.constant 0.000000e+00 : f32
      %106 = vector.broadcast %cst_66 : f32 to vector<1x10x128xf32>
      %c9 = arith.constant 9 : index
      %c0_67 = arith.constant 0 : index
      %c0_68 = arith.constant 0 : index
      %107 = vector.load %arg13[%c9, %c0_67, %c0_68] : memref<10x10x128xf32, #tpu.memory_space<vmem>>, vector<1x10x128xf32>
      tpu.vector_store %arg13[%c9, %c0_67, %c0_68], %106 {strides = array<i32>} : memref<10x10x128xf32, #tpu.memory_space<vmem>>, vector<1x10x128xf32>,
      %cst_69 = arith.constant 0.000000e+00 : f32
      %108 = vector.broadcast %cst_69 : f32 to vector<10x1x128xf32>
      %c0_70 = arith.constant 0 : index
      %c0_71 = arith.constant 0 : index
      %c0_72 = arith.constant 0 : index
      %109 = vector.load %arg13[%c0_70, %c0_71, %c0_72] : memref<10x10x128xf32, #tpu.memory_space<vmem>>, vector<10x1x128xf32>
      tpu.vector_store %arg13[%c0_70, %c0_71, %c0_72], %108 {strides = array<i32>} : memref<10x10x128xf32, #tpu.memory_space<vmem>>, vector<10x1x128xf32>,
      %cst_73 = arith.constant 0.000000e+00 : f32
      %110 = vector.broadcast %cst_73 : f32 to vector<10x1x128xf32>
      %c0_74 = arith.constant 0 : index
      %c9_75 = arith.constant 9 : index
      %c0_76 = arith.constant 0 : index
      %111 = vector.load %arg13[%c0_74, %c9_75, %c0_76] : memref<10x10x128xf32, #tpu.memory_space<vmem>>, vector<10x1x128xf32>
      tpu.vector_store %arg13[%c0_74, %c9_75, %c0_76], %110 {strides = array<i32>} : memref<10x10x128xf32, #tpu.memory_space<vmem>>, vector<10x1x128xf32>,
      %cst_77 = arith.constant 0.000000e+00 : f32
      %112 = vector.broadcast %cst_77 : f32 to vector<64x32xf32>
      %c0_78 = arith.constant 0 : index
      %c0_79 = arith.constant 0 : index
      %113 = vector.load %arg14[%c0_78, %c0_79] : memref<64x32xf32, #tpu.memory_space<vmem>>, vector<64x32xf32>
      tpu.vector_store %arg14[%c0_78, %c0_79], %112 {strides = array<i32>} : memref<64x32xf32, #tpu.memory_space<vmem>>, vector<64x32xf32>,
    } else {
    }
    %c0 = arith.constant 0 : index
    %c0_1 = arith.constant 0 : index
    %c0_2 = arith.constant 0 : index
    %3 = vector.load %arg2[%c0, %c0_1, %c0_2] : memref<1x64x32xbf16, #tpu.memory_space<vmem>>, vector<1x64x32xbf16>
    %4 = vector.shape_cast %3 : vector<1x64x32xbf16> to vector<64x32xbf16>
    %c0_3 = arith.constant 0 : index
    %c0_4 = arith.constant 0 : index
    %5 = vector.load %arg3[%c0_3, %c0_4] : memref<32x128xbf16, #tpu.memory_space<vmem>>, vector<32x128xbf16>
    %cst = arith.constant dense<0.000000e+00> : vector<64x128xf32>
    %6 = tpu.matmul %4, %5, %cst {dimension_numbers = #tpu.dot_dimension_numbers<[1], [0], [0], [1], [0, 0, 1, 1], [], []>} : vector<64x32xbf16>, vector<32x128xbf16>, vector<64x128xf32> -> vector<64x128xf32>
    %c0_5 = arith.constant 0 : index
    %c0_6 = arith.constant 0 : index
    %7 = vector.load %arg4[%c0_5, %c0_6] : memref<1x128xf32, #tpu.memory_space<vmem>>, vector<1x128xf32>
    %8 = vector.broadcast %7 : vector<1x128xf32> to vector<64x128xf32>
    %9 = arith.mulf %6, %8 : vector<64x128xf32>
    %c0_7 = arith.constant 0 : index
    %c0_8 = arith.constant 0 : index
    %10 = vector.load %arg5[%c0_7, %c0_8] : memref<1x128xf32, #tpu.memory_space<vmem>>, vector<1x128xf32>
    %11 = vector.broadcast %10 : vector<1x128xf32> to vector<64x128xf32>
    %12 = arith.addf %9, %11 : vector<64x128xf32>
    %cst_9 = arith.constant 5.000000e-01 : f32
    %13 = vector.broadcast %cst_9 : f32 to vector<64x128xf32>
    %14 = arith.mulf %13, %12 : vector<64x128xf32>
    %cst_10 = arith.constant 4.471500e-02 : f32
    %15 = vector.broadcast %cst_10 : f32 to vector<64x128xf32>
    %16 = arith.mulf %15, %12 : vector<64x128xf32>
    %17 = arith.mulf %16, %12 : vector<64x128xf32>
    %18 = arith.mulf %17, %12 : vector<64x128xf32>
    %19 = arith.addf %12, %18 : vector<64x128xf32>
    %cst_11 = arith.constant 0.797884583 : f32
    %20 = vector.broadcast %cst_11 : f32 to vector<64x128xf32>
    %21 = arith.mulf %20, %19 : vector<64x128xf32>
    %22 = math.tanh %21 : vector<64x128xf32>
    %cst_12 = arith.constant 1.000000e+00 : f32
    %23 = vector.broadcast %cst_12 : f32 to vector<64x128xf32>
    %24 = arith.addf %23, %22 : vector<64x128xf32>
    %25 = arith.mulf %14, %24 : vector<64x128xf32>
    %26 = vector.shape_cast %25 : vector<64x128xf32> to vector<8x8x128xf32>
    %c1 = arith.constant 1 : index
    %c1_13 = arith.constant 1 : index
    %c0_14 = arith.constant 0 : index
    %27 = vector.load %arg13[%c1, %c1_13, %c0_14] : memref<10x10x128xf32, #tpu.memory_space<vmem>>, vector<8x8x128xf32>
    tpu.vector_store %arg13[%c1, %c1_13, %c0_14], %26 {strides = array<i32>} : memref<10x10x128xf32, #tpu.memory_space<vmem>>, vector<8x8x128xf32>,
    %c0_15 = arith.constant 0 : index
    %c0_16 = arith.constant 0 : index
    %c0_17 = arith.constant 0 : index
    %28 = vector.load %arg6[%c0_15, %c0_16, %c0_17] : memref<3x3x128xf32, #tpu.memory_space<vmem>>, vector<3x3x128xf32>
    %cst_18 = arith.constant 0.000000e+00 : f32
    %29 = vector.broadcast %cst_18 : f32 to vector<8x8x128xf32>
    %c0_19 = arith.constant 0 : index
    %c0_20 = arith.constant 0 : index
    %c0_21 = arith.constant 0 : index
    %30 = vector.load %arg13[%c0_19, %c0_20, %c0_21] : memref<10x10x128xf32, #tpu.memory_space<vmem>>, vector<8x8x128xf32>
    %31 = vector.extract_strided_slice %28 {offsets = [0, 0, 0], sizes = [1, 1, 128], strides = [1, 1, 1]} : vector<3x3x128xf32> to vector<1x1x128xf32>
    %32 = vector.broadcast %31 : vector<1x1x128xf32> to vector<8x8x128xf32>
    %33 = arith.mulf %30, %32 : vector<8x8x128xf32>
    %34 = arith.addf %29, %33 : vector<8x8x128xf32>
    %c0_22 = arith.constant 0 : index
    %c1_23 = arith.constant 1 : index
    %c0_24 = arith.constant 0 : index
    %35 = vector.load %arg13[%c0_22, %c1_23, %c0_24] : memref<10x10x128xf32, #tpu.memory_space<vmem>>, vector<8x8x128xf32>
    %36 = vector.extract_strided_slice %28 {offsets = [0, 1, 0], sizes = [1, 1, 128], strides = [1, 1, 1]} : vector<3x3x128xf32> to vector<1x1x128xf32>
    %37 = vector.broadcast %36 : vector<1x1x128xf32> to vector<8x8x128xf32>
    %38 = arith.mulf %35, %37 : vector<8x8x128xf32>
    %39 = arith.addf %34, %38 : vector<8x8x128xf32>
    %c0_25 = arith.constant 0 : index
    %c2 = arith.constant 2 : index
    %c0_26 = arith.constant 0 : index
    %40 = vector.load %arg13[%c0_25, %c2, %c0_26] : memref<10x10x128xf32, #tpu.memory_space<vmem>>, vector<8x8x128xf32>
    %41 = vector.extract_strided_slice %28 {offsets = [0, 2, 0], sizes = [1, 1, 128], strides = [1, 1, 1]} : vector<3x3x128xf32> to vector<1x1x128xf32>
    %42 = vector.broadcast %41 : vector<1x1x128xf32> to vector<8x8x128xf32>
    %43 = arith.mulf %40, %42 : vector<8x8x128xf32>
    %44 = arith.addf %39, %43 : vector<8x8x128xf32>
    %c1_27 = arith.constant 1 : index
    %c0_28 = arith.constant 0 : index
    %c0_29 = arith.constant 0 : index
    %45 = vector.load %arg13[%c1_27, %c0_28, %c0_29] : memref<10x10x128xf32, #tpu.memory_space<vmem>>, vector<8x8x128xf32>
    %46 = vector.extract_strided_slice %28 {offsets = [1, 0, 0], sizes = [1, 1, 128], strides = [1, 1, 1]} : vector<3x3x128xf32> to vector<1x1x128xf32>
    %47 = vector.broadcast %46 : vector<1x1x128xf32> to vector<8x8x128xf32>
    %48 = arith.mulf %45, %47 : vector<8x8x128xf32>
    %49 = arith.addf %44, %48 : vector<8x8x128xf32>
    %c1_30 = arith.constant 1 : index
    %c1_31 = arith.constant 1 : index
    %c0_32 = arith.constant 0 : index
    %50 = vector.load %arg13[%c1_30, %c1_31, %c0_32] : memref<10x10x128xf32, #tpu.memory_space<vmem>>, vector<8x8x128xf32>
    %51 = vector.extract_strided_slice %28 {offsets = [1, 1, 0], sizes = [1, 1, 128], strides = [1, 1, 1]} : vector<3x3x128xf32> to vector<1x1x128xf32>
    %52 = vector.broadcast %51 : vector<1x1x128xf32> to vector<8x8x128xf32>
    %53 = arith.mulf %50, %52 : vector<8x8x128xf32>
    %54 = arith.addf %49, %53 : vector<8x8x128xf32>
    %c1_33 = arith.constant 1 : index
    %c2_34 = arith.constant 2 : index
    %c0_35 = arith.constant 0 : index
    %55 = vector.load %arg13[%c1_33, %c2_34, %c0_35] : memref<10x10x128xf32, #tpu.memory_space<vmem>>, vector<8x8x128xf32>
    %56 = vector.extract_strided_slice %28 {offsets = [1, 2, 0], sizes = [1, 1, 128], strides = [1, 1, 1]} : vector<3x3x128xf32> to vector<1x1x128xf32>
    %57 = vector.broadcast %56 : vector<1x1x128xf32> to vector<8x8x128xf32>
    %58 = arith.mulf %55, %57 : vector<8x8x128xf32>
    %59 = arith.addf %54, %58 : vector<8x8x128xf32>
    %c2_36 = arith.constant 2 : index
    %c0_37 = arith.constant 0 : index
    %c0_38 = arith.constant 0 : index
    %60 = vector.load %arg13[%c2_36, %c0_37, %c0_38] : memref<10x10x128xf32, #tpu.memory_space<vmem>>, vector<8x8x128xf32>
    %61 = vector.extract_strided_slice %28 {offsets = [2, 0, 0], sizes = [1, 1, 128], strides = [1, 1, 1]} : vector<3x3x128xf32> to vector<1x1x128xf32>
    %62 = vector.broadcast %61 : vector<1x1x128xf32> to vector<8x8x128xf32>
    %63 = arith.mulf %60, %62 : vector<8x8x128xf32>
    %64 = arith.addf %59, %63 : vector<8x8x128xf32>
    %c2_39 = arith.constant 2 : index
    %c1_40 = arith.constant 1 : index
    %c0_41 = arith.constant 0 : index
    %65 = vector.load %arg13[%c2_39, %c1_40, %c0_41] : memref<10x10x128xf32, #tpu.memory_space<vmem>>, vector<8x8x128xf32>
    %66 = vector.extract_strided_slice %28 {offsets = [2, 1, 0], sizes = [1, 1, 128], strides = [1, 1, 1]} : vector<3x3x128xf32> to vector<1x1x128xf32>
    %67 = vector.broadcast %66 : vector<1x1x128xf32> to vector<8x8x128xf32>
    %68 = arith.mulf %65, %67 : vector<8x8x128xf32>
    %69 = arith.addf %64, %68 : vector<8x8x128xf32>
    %c2_42 = arith.constant 2 : index
    %c2_43 = arith.constant 2 : index
    %c0_44 = arith.constant 0 : index
    %70 = vector.load %arg13[%c2_42, %c2_43, %c0_44] : memref<10x10x128xf32, #tpu.memory_space<vmem>>, vector<8x8x128xf32>
    %71 = vector.extract_strided_slice %28 {offsets = [2, 2, 0], sizes = [1, 1, 128], strides = [1, 1, 1]} : vector<3x3x128xf32> to vector<1x1x128xf32>
    %72 = vector.broadcast %71 : vector<1x1x128xf32> to vector<8x8x128xf32>
    %73 = arith.mulf %70, %72 : vector<8x8x128xf32>
    %74 = arith.addf %69, %73 : vector<8x8x128xf32>
    %75 = vector.shape_cast %74 : vector<8x8x128xf32> to vector<64x128xf32>
    %c0_45 = arith.constant 0 : index
    %c0_46 = arith.constant 0 : index
    %76 = vector.load %arg7[%c0_45, %c0_46] : memref<1x128xf32, #tpu.memory_space<vmem>>, vector<1x128xf32>
    %77 = vector.broadcast %76 : vector<1x128xf32> to vector<64x128xf32>
    %78 = arith.mulf %75, %77 : vector<64x128xf32>
    %c0_47 = arith.constant 0 : index
    %c0_48 = arith.constant 0 : index
    %79 = vector.load %arg8[%c0_47, %c0_48] : memref<1x128xf32, #tpu.memory_space<vmem>>, vector<1x128xf32>
    %80 = vector.broadcast %79 : vector<1x128xf32> to vector<64x128xf32>
    %81 = arith.addf %78, %80 : vector<64x128xf32>
    %cst_49 = arith.constant 5.000000e-01 : f32
    %82 = vector.broadcast %cst_49 : f32 to vector<64x128xf32>
    %83 = arith.mulf %82, %81 : vector<64x128xf32>
    %cst_50 = arith.constant 4.471500e-02 : f32
    %84 = vector.broadcast %cst_50 : f32 to vector<64x128xf32>
    %85 = arith.mulf %84, %81 : vector<64x128xf32>
    %86 = arith.mulf %85, %81 : vector<64x128xf32>
    %87 = arith.mulf %86, %81 : vector<64x128xf32>
    %88 = arith.addf %81, %87 : vector<64x128xf32>
    %cst_51 = arith.constant 0.797884583 : f32
    %89 = vector.broadcast %cst_51 : f32 to vector<64x128xf32>
    %90 = arith.mulf %89, %88 : vector<64x128xf32>
    %91 = math.tanh %90 : vector<64x128xf32>
    %cst_52 = arith.constant 1.000000e+00 : f32
    %92 = vector.broadcast %cst_52 : f32 to vector<64x128xf32>
    %93 = arith.addf %92, %91 : vector<64x128xf32>
    %94 = arith.mulf %83, %93 : vector<64x128xf32>
    %c0_53 = arith.constant 0 : index
    %c0_54 = arith.constant 0 : index
    %95 = vector.load %arg14[%c0_53, %c0_54] : memref<64x32xf32, #tpu.memory_space<vmem>>, vector<64x32xf32>
    %96 = arith.truncf %94 : vector<64x128xf32> to vector<64x128xbf16>
    %c0_55 = arith.constant 0 : index
    %c0_56 = arith.constant 0 : index
    %97 = vector.load %arg9[%c0_55, %c0_56] : memref<128x32xbf16, #tpu.memory_space<vmem>>, vector<128x32xbf16>
    %cst_57 = arith.constant dense<0.000000e+00> : vector<64x32xf32>
    %98 = tpu.matmul %96, %97, %cst_57 {dimension_numbers = #tpu.dot_dimension_numbers<[1], [0], [0], [1], [0, 0, 1, 1], [], []>} : vector<64x128xbf16>, vector<128x32xbf16>, vector<64x32xf32> -> vector<64x32xf32>
    %99 = arith.addf %95, %98 : vector<64x32xf32>
    %c0_58 = arith.constant 0 : index
    %c0_59 = arith.constant 0 : index
    %100 = vector.load %arg14[%c0_58, %c0_59] : memref<64x32xf32, #tpu.memory_space<vmem>>, vector<64x32xf32>
    tpu.vector_store %arg14[%c0_58, %c0_59], %99 {strides = array<i32>} : memref<64x32xf32, #tpu.memory_space<vmem>>, vector<64x32xf32>,
    %c0_i32_60 = arith.constant 0 : i32
    %101 = arith.cmpi eq, %arg1, %c0_i32_60 : i32
    %102 = arith.extui %101 : i1 to i32
    %c0_i32_61 = arith.constant 0 : i32
    %103 = arith.cmpi ne, %102, %c0_i32_61 : i32
    scf.if %103 {
      %c0_62 = arith.constant 0 : index
      %c0_63 = arith.constant 0 : index
      %104 = vector.load %arg14[%c0_62, %c0_63] : memref<64x32xf32, #tpu.memory_space<vmem>>, vector<64x32xf32>
      %c0_64 = arith.constant 0 : index
      %c0_65 = arith.constant 0 : index
      %105 = vector.load %arg10[%c0_64, %c0_65] : memref<1x32xf32, #tpu.memory_space<vmem>>, vector<1x32xf32>
      %106 = vector.broadcast %105 : vector<1x32xf32> to vector<64x32xf32>
      %107 = arith.mulf %104, %106 : vector<64x32xf32>
      %c0_66 = arith.constant 0 : index
      %c0_67 = arith.constant 0 : index
      %108 = vector.load %arg11[%c0_66, %c0_67] : memref<1x32xf32, #tpu.memory_space<vmem>>, vector<1x32xf32>
      %109 = vector.broadcast %108 : vector<1x32xf32> to vector<64x32xf32>
      %110 = arith.addf %107, %109 : vector<64x32xf32>
      %c0_68 = arith.constant 0 : index
      %c0_69 = arith.constant 0 : index
      %c0_70 = arith.constant 0 : index
      %111 = vector.load %arg12[%c0_68, %c0_69, %c0_70] : memref<1x64x32xf32, #tpu.memory_space<vmem>>, vector<1x64x32xf32>
      %112 = vector.shape_cast %111 : vector<1x64x32xf32> to vector<64x32xf32>
      %113 = vector.shape_cast %110 : vector<64x32xf32> to vector<1x64x32xf32>
      tpu.vector_store %arg12[%c0_68, %c0_69, %c0_70], %113 {strides = array<i32>} : memref<1x64x32xf32, #tpu.memory_space<vmem>>, vector<1x64x32xf32>,
    } else {
    }
    return
  }
  func.func @transform_0(%arg0: i32, %arg1: i32) -> (i32, i32, i32) {
    %c0_i32 = arith.constant 0 : i32
    %c0_i32_0 = arith.constant 0 : i32
    %c0_i32_1 = arith.constant 0 : i32
    return %arg0, %c0_i32, %c0_i32_0 : i32, i32, i32
  }
  func.func @transform_1(%arg0: i32, %arg1: i32) -> (i32, i32) {
    %c0_i32 = arith.constant 0 : i32
    %c0_i32_0 = arith.constant 0 : i32
    return %c0_i32, %arg1 : i32, i32
  }
  func.func @transform_2(%arg0: i32, %arg1: i32) -> (i32, i32) {
    %c0_i32 = arith.constant 0 : i32
    %c0_i32_0 = arith.constant 0 : i32
    return %c0_i32, %arg1 : i32, i32
  }
  func.func @transform_3(%arg0: i32, %arg1: i32) -> (i32, i32) {
    %c0_i32 = arith.constant 0 : i32
    %c0_i32_0 = arith.constant 0 : i32
    return %c0_i32, %arg1 : i32, i32
  }
  func.func @transform_4(%arg0: i32, %arg1: i32) -> (i32, i32, i32) {
    %c0_i32 = arith.constant 0 : i32
    %c0_i32_0 = arith.constant 0 : i32
    %c0_i32_1 = arith.constant 0 : i32
    return %c0_i32, %c0_i32_0, %arg1 : i32, i32, i32
  }
  func.func @transform_5(%arg0: i32, %arg1: i32) -> (i32, i32) {
    %c0_i32 = arith.constant 0 : i32
    %c0_i32_0 = arith.constant 0 : i32
    return %c0_i32, %arg1 : i32, i32
  }
  func.func @transform_6(%arg0: i32, %arg1: i32) -> (i32, i32) {
    %c0_i32 = arith.constant 0 : i32
    %c0_i32_0 = arith.constant 0 : i32
    return %c0_i32, %arg1 : i32, i32
  }
  func.func @transform_7(%arg0: i32, %arg1: i32) -> (i32, i32) {
    %c0_i32 = arith.constant 0 : i32
    %c0_i32_0 = arith.constant 0 : i32
    return %arg1, %c0_i32 : i32, i32
  }
  func.func @transform_8(%arg0: i32, %arg1: i32) -> (i32, i32) {
    %c0_i32 = arith.constant 0 : i32
    %c0_i32_0 = arith.constant 0 : i32
    %c0_i32_1 = arith.constant 0 : i32
    return %c0_i32, %c0_i32_0 : i32, i32
  }
  func.func @transform_9(%arg0: i32, %arg1: i32) -> (i32, i32) {
    %c0_i32 = arith.constant 0 : i32
    %c0_i32_0 = arith.constant 0 : i32
    %c0_i32_1 = arith.constant 0 : i32
    return %c0_i32, %c0_i32_0 : i32, i32
  }
  func.func @transform_10(%arg0: i32, %arg1: i32) -> (i32, i32, i32) {
    %c0_i32 = arith.constant 0 : i32
    %c0_i32_0 = arith.constant 0 : i32
    %c0_i32_1 = arith.constant 0 : i32
    return %arg0, %c0_i32, %c0_i32_0 : i32, i32, i32
  }
}

</mosaic_0001>

<bundles_post_ra>
// kernel: tpu_custom_call.1
= control target key start
LH: loop header
LB: loop body
LE: loop exit
PB: predicated region body
PF: predicated region fallthrough
CT: control target
= control target key end

     0   :  { %s1726_s13 = smov 0   ;;  %s1728_s14 = smov 0   ;;  %s2122_s0 = inlined_call_operand.vmem [shape: bf16[2,64,32], index: 0, kind: input, shape index: {}]   ;;  %s2123_s1 = inlined_call_operand.vmem [shape: bf16[32,128], index: 1, kind: input, shape index: {}]   ;;  %s2124_s2 = inlined_call_operand.vmem [shape: f32[1,128], index: 2, kind: input, shape index: {}]   ;;  %s2125_s3 = inlined_call_operand.vmem [shape: f32[1,128], index: 3, kind: input, shape index: {}]   ;;  %s2126_s4 = inlined_call_operand.vmem [shape: f32[3,3,128], index: 4, kind: input, shape index: {}]   ;;  %s2127_s5 = inlined_call_operand.vmem [shape: f32[1,128], index: 5, kind: input, shape index: {}]   ;;  %s2128_s6 = inlined_call_operand.vmem [shape: f32[1,128], index: 6, kind: input, shape index: {}]   ;;  %s2129_s7 = inlined_call_operand.vmem [shape: bf16[128,32], index: 7, kind: input, shape index: {}]   ;;  %s2130_s8 = inlined_call_operand.vmem [shape: f32[1,32], index: 8, kind: input, shape index: {}]   ;;  %s2131_s9 = inlined_call_operand.vmem [shape: f32[1,32], index: 9, kind: input, shape index: {}]   ;;  %s2132_s10 = inlined_call_operand.vmem [shape: f32[2,64,32], index: 10, kind: output, shape index: {}]  }
   0x1   :  { %s1730_s15 = smov 0  }
   0x2 LB: > { %s32_s16 = sadd.s32 1, %s1664_s14  ;;  %p1488_p0 = scmp.ge.s32.totalorder %s1668_s15, 1  ;;  %s1668_s15 = sphi %s1730_s15, %s20_s15   ;;  %s1664_s14 = sphi %s1728_s14, %s2134_s14   ;;  %s1660_s13 = sphi %s1726_s13, %s2133_s13  }
   0x3   : > { %p34_p1 = scmp.ge.s32.totalorder %s32_s16, 2  ;;  %p385_p2 = scmp.lt.s32.totalorder %s1668_s15, 3 }
   0x5   : > { %s2136_s16 = smov (%p34_p1, %s32_s16), 0  ;;  %p386_p3 = pnand %p1488_p0, %p385_p2 }
   0x6   : > { %v1600_v0 = vld [vmem:[%s2123_s1] sm:$0xff] (!%p386_p3)   ;;  %p448_p4 = scmp.lt.s32.totalorder (!%p386_p3), %s1660_s13, 1  ;;  %v1601_v1 = vld [vmem:[%s2123_s1 + $0x8] sm:$0xff] (!%p386_p3)   ;;  %vm514_vm0 = vcmask (!%p386_p3), 261120   ;;  %v1670_v6 = vmov (!%p386_p3), 0.0   ;;  %v1608_v9 = vld [vmem:[%s2129_s7 + $0x10] sm:$0xff] (!%p386_p3)   ;;  %v767_v31 = vlaneseq (!%p386_p3) }
   0x7   : > { %389 = sbr.rel (%p386_p3) target bundleno = 576 (0x240), region = 60  ;;  %1539 = vmatprep.subr.bf16.mxu0 (!%p386_p3), %v1600_v0  ;;  %489 = vst [vmem:[#allocation2] sm:$0xff] (!%p386_p3), %v1670_v6  ;;  %490 = vst [vmem:[#allocation2 + $0x8] sm:$0x3] (!%p386_p3), %v1670_v6  ;;  %v1606_v7 = vld [vmem:[%s2129_s7] sm:$0xff] (!%p386_p3)   ;;  %v1607_v8 = vld [vmem:[%s2129_s7 + $0x8] sm:$0xff] (!%p386_p3)  }
   0x8   : > { %1540 = vmatpush3.bf16.msra.mxu0 (!%p386_p3), %v1600_v0  ;;  %495 = vst [vmem:[#allocation2 + $0x10] sm:$0x1] (!%p386_p3), %v1670_v6  ;;  %496 = vst [vmem:[#allocation2 + $0x20] sm:$0x1] (!%p386_p3), %v1670_v6  ;;  %1551 = vmatprep.subr.bf16.mxu1 (!%p386_p3), %v1606_v7  ;;  %v1609_v10 = vld [vmem:[%s2129_s7 + $0x18] sm:$0xff] (!%p386_p3)   ;;  %v1610_v11 = vld [vmem:[%s2129_s7 + $0x20] sm:$0xff] (!%p386_p3)  }
   0x9   : > { %1541 = vmatprep.subr.bf16.mxu0 (!%p386_p3), %v1601_v1  ;;  %497 = vst [vmem:[#allocation2 + $0x30] sm:$0x1] (!%p386_p3), %v1670_v6  ;;  %505 = vst [vmem:[#allocation2 + $0x19] sm:$0x1] (!%p386_p3), %v1670_v6  ;;  %1552 = vmatpush3.bf16.msra.mxu1 (!%p386_p3), %v1606_v7  ;;  %v1611_v12 = vld [vmem:[%s2129_s7 + $0x28] sm:$0xff] (!%p386_p3)   ;;  %v1612_v13 = vld [vmem:[%s2129_s7 + $0x30] sm:$0xff] (!%p386_p3)  }
   0xa   : > { %506 = vst [vmem:[#allocation2 + $0x29] sm:$0x1] (!%p386_p3), %v1670_v6  ;;  %507 = vst [vmem:[#allocation2 + $0x39] sm:$0x1] (!%p386_p3), %v1670_v6  ;;  %1553 = vmatprep.subr.bf16.mxu1 (!%p386_p3), %v1607_v8  ;;  %v1613_v14 = vld [vmem:[%s2129_s7 + $0x38] sm:$0xff] (!%p386_p3)   ;;  %v768_v45 = vshrl.u32 (!%p386_p3), %v767_v31, 7 }
   0xb   : > { %492 = vst [vmem:[#allocation2 + $0x90] sm:$0xff] (!%p386_p3), %v1670_v6  ;;  %493 = vst [vmem:[#allocation2 + $0x98] sm:$0x3] (!%p386_p3), %v1670_v6  ;;  %v1503_v15 = vld [vmem:[%s2124_s2] ss:$0 sm:$0xff] (!%p386_p3) }
   0xc   : > { %1542 = vmatpush3.bf16.msra.mxu0 (!%p386_p3), %v1601_v1  ;;  %498 = vst [vmem:[#allocation2 + $0x40] sm:$0x1] (!%p386_p3), %v1670_v6  ;;  %499 = vst [vmem:[#allocation2 + $0x50] sm:$0x1] (!%p386_p3), %v1670_v6  ;;  %v1504_v17 = vld [vmem:[%s2125_s3] ss:$0 sm:$0xff] (!%p386_p3) }
   0xd   : > { %500 = vst [vmem:[#allocation2 + $0x60] sm:$0x1] (!%p386_p3), %v1670_v6  ;;  %501 = vst [vmem:[#allocation2 + $0x70] sm:$0x1] (!%p386_p3), %v1670_v6  ;;  %1554 = vmatpush3.bf16.msra.mxu1 (!%p386_p3), %v1607_v8  ;;  %v1828_v61 = vsub.s32 (!%p386_p3), 0, %v768_v45 }
   0xe   : > { %s2138_s13 = smov (!%p448_p4, %s1660_s13), 1  ;;  %502 = vst [vmem:[#allocation2 + $0x80] sm:$0x1] %v1670_v6  ;;  %508 = vst [vmem:[#allocation2 + $0x49] sm:$0x1] %v1670_v6  ;;  %1555 = vmatprep.subr.bf16.mxu1 %v1608_v9 }
   0xf   : > { %s1519_s21 = sshll.u32 %s2138_s13, 5  ;;  %509 = vst [vmem:[#allocation2 + $0x59] sm:$0x1] %v1670_v6  ;;  %510 = vst [vmem:[#allocation2 + $0x69] sm:$0x1] %v1670_v6  ;;  %s1520_s25 = sshll.u32 %s2138_s13, 6 }
  0x10   : > { %s452_s24 = scalar_lea.vmem %s2122_s0, %s1519_s21  ;;  %511 = vst [vmem:[#allocation2 + $0x79] sm:$0x1] %v1670_v6  ;;  %512 = vst [vmem:[#allocation2 + $0x89] sm:$0x1] %v1670_v6  ;;  %s2091_s30 = scalar_lea.vmem %s2132_s10, %s1520_s25 }
  0x11   : > { %v1602_v2 = vld [vmem:[%s452_s24] sm:$0xff]   ;;  %v1603_v3 = vld [vmem:[%s452_s24 + $0x8] sm:$0xff]   ;;  %v1604_v4 = vld [vmem:[%s452_s24 + $0x10] sm:$0xff]   ;;  %515 = vst.msk [vmem:[#allocation3] sm:$0xff] %vm514_vm0, %v1670_v6  ;;  %1556 = vmatpush3.bf16.msra.mxu1 %v1608_v9 }
  0x12   : > { %1543 = vmatprep.mubr.msk.bf16.mxu0 %vm514_vm0, %v1602_v2  ;;  %v1605_v5 = vld [vmem:[%s452_s24 + $0x18] sm:$0xff]   ;;  %516 = vst.msk [vmem:[#allocation3 + $0x8] sm:$0xff] %vm514_vm0, %v1670_v6  ;;  %517 = vst.msk [vmem:[#allocation3 + $0x10] sm:$0xff] %vm514_vm0, %v1670_v6  ;;  %1557 = vmatprep.subr.bf16.mxu1 %v1609_v10  ;;  %v756_v9 = vld [vmem:[%s2126_s4] sm:$0x7] }
  0x13   : > { %1544 = vmatmul.mubr.msk.bf16.vlgmr.msra.gmra.mrb[0].mxu0 %vm514_vm0, %v1603_v3  ;;  %518 = vst.msk [vmem:[#allocation3 + $0x18] sm:$0xff] %vm514_vm0, %v1670_v6  ;;  %519 = vst.msk [vmem:[#allocation3 + $0x20] sm:$0xff] %vm514_vm0, %v1670_v6 }
  0x14   : > { %1547 = vmatprep.mubr.msk.bf16.mxu0 %vm514_vm0, %v1604_v4  ;;  %520 = vst.msk [vmem:[#allocation3 + $0x28] sm:$0xff] %vm514_vm0, %v1670_v6  ;;  %521 = vst.msk [vmem:[#allocation3 + $0x30] sm:$0xff] %vm514_vm0, %v1670_v6 }
  0x15   : > { %522 = vst.msk [vmem:[#allocation3 + $0x38] sm:$0xff] %vm514_vm0, %v1670_v6  ;;  %494 = vst [vmem:[#allocation2] sm:$0x1] %v1670_v6  ;;  %1558 = vmatpush3.bf16.msra.mxu1 %v1609_v10 }
  0x16   : > { %504 = vst [vmem:[#allocation2 + $0x9] sm:$0x1] %v1670_v6  ;;  %503 = vst [vmem:[#allocation2 + $0x90] sm:$0x1] %v1670_v6  ;;  %1559 = vmatprep.subr.bf16.mxu1 %v1610_v11 }
  0x17   : > { %513 = vst [vmem:[#allocation2 + $0x99] sm:$0x1] %v1670_v6  ;;  %v797_v6 = vsub.s32 1, %v768_v45 }
  0x19   : > { %1560 = vmatpush3.bf16.msra.mxu1 %v1610_v11 }
  0x1a   : > { %1561 = vmatprep.subr.bf16.mxu1 %v1611_v12 }
  0x1b   : > { %1548 = vmatmul.mubr.msk.bf16.gmra.mrb[4].mxu0 %vm514_vm0, %v1605_v5 }
  0x1d   : > { %1562 = vmatpush3.bf16.msra.mxu1 %v1611_v12  ;;  %v1846_v12 = vrot.slane %v756_v9, %v1828_v61 }
  0x1e   : > { %1563 = vmatprep.subr.bf16.mxu1 %v1612_v13 }
  0x21   : > { %1564 = vmatpush3.bf16.msra.mxu1 %v1612_v13 }
  0x22   : > { %1565 = vmatprep.subr.bf16.mxu1 %v1613_v14 }
  0x25   : > { %1566 = vmatpush3.bf16.msra.mxu1 %v1613_v14 }
  0xe6   : > { %v1545_v16 = vpop.f32.mrb[0].mxu0 }
  0xe7   : > { %v654_v18 = vmul.f32 %v1545_v16, %v1503_v15  ;;  %v614_v19 = vpop.f32.mrb[1].mxu0  ;;  %v787_v16 = vld [vmem:[#allocation2 + $0x1] sm:$0xff] }
  0xe8   : > { %v652_v20 = vmul.f32 %v1503_v15, %v614_v19  ;;  %v1546_v21 = vpop.f32.mrb[2].mxu0  ;;  %v1851_v19 = vrot.slane %v756_v9, %v797_v6 }
  0xe9   : > { %v1798_v22 = vadd.f32 %v1504_v17, %v654_v18  ;;  %v655_v23 = vmul.f32 %v1546_v21, %v1503_v15  ;;  %v617_v24 = vpop.f32.mrb[3].mxu0 }
  0xea   : > { %v1800_v25 = vadd.f32 %v1504_v17, %v652_v20  ;;  %v653_v26 = vmul.f32 %v1503_v15, %v617_v24  ;;  %v825_v20 = vsub.s32 2, %v768_v45 }
  0xeb   : > { %v685_v27 = vmul.f32 0.044715, %v1798_v22  ;;  %v1803_v28 = vadd.f32 %v1504_v17, %v655_v23 }
  0xec   : > { %v683_v29 = vmul.f32 0.044715, %v1800_v25  ;;  %v1806_v30 = vadd.f32 %v1504_v17, %v653_v26 }
  0xed   : > { %v693_v32 = vmul.f32 %v685_v27, %v1798_v22  ;;  %v686_v33 = vmul.f32 0.044715, %v1803_v28  ;;  %v799_v27 = vmul.f32 %v1851_v19, %v787_v16 }
  0xee   : > { %v691_v34 = vmul.f32 %v683_v29, %v1800_v25  ;;  %v684_v35 = vmul.f32 0.044715, %v1806_v30  ;;  %v1549_v36 = vpop.f32.mrb[4].mxu0 }
  0xef   : > { %v701_v37 = vmul.f32 %v693_v32, %v1798_v22  ;;  %v694_v38 = vmul.f32 %v686_v33, %v1803_v28  ;;  %v658_v39 = vmul.f32 %v1549_v36, %v1503_v15  ;;  %v630_v40 = vpop.f32.mrb[5].mxu0  ;;  %v1858_v33 = vrot.slane %v756_v9, %v825_v20 }
  0xf0   : > { %v699_v41 = vmul.f32 %v691_v34, %v1800_v25  ;;  %v692_v42 = vmul.f32 %v684_v35, %v1806_v30  ;;  %v656_v43 = vmul.f32 %v1503_v15, %v630_v40  ;;  %v1550_v44 = vpop.f32.mrb[6].mxu0  ;;  %v677_v35 = vmul.f32 0.5, %v1798_v22 }
  0xf1   : > { %v709_v46 = vadd.f32 %v701_v37, %v1798_v22  ;;  %v702_v47 = vmul.f32 %v694_v38, %v1803_v28  ;;  %v1818_v48 = vadd.f32 %v1504_v17, %v658_v39  ;;  %v659_v49 = vmul.f32 %v1550_v44, %v1503_v15  ;;  %v633_v50 = vpop.f32.mrb[7].mxu0  ;;  %v815_v38 = vld [vmem:[#allocation2 + $0x2] sm:$0xff] }
  0xf2   : > { %v707_v51 = vadd.f32 %v699_v41, %v1800_v25  ;;  %v700_v52 = vmul.f32 %v692_v42, %v1806_v30  ;;  %v1822_v53 = vadd.f32 %v1504_v17, %v656_v43  ;;  %v657_v54 = vmul.f32 %v1503_v15, %v633_v50  ;;  %v759_v15 = vld [vmem:[#allocation2] sm:$0xff]  ;;  %v758_v42 = vld [vmem:[%s2126_s4 + $0x8] sm:$0x7] }
  0xf3   : > { %v717_v55 = vmul.f32 0.7978846, %v709_v46  ;;  %v710_v56 = vadd.f32 %v702_v47, %v1803_v28  ;;  %v689_v57 = vmul.f32 0.044715, %v1818_v48  ;;  %v1831_v0 = vadd.f32 %v1504_v17, %v659_v49  ;;  %v757_v22 = vld [vmem:[%s2126_s4 + $0x4] sm:$0x7] }
  0xf4   : > { %v715_v58 = vmul.f32 0.7978846, %v707_v51  ;;  %v708_v59 = vadd.f32 %v700_v52, %v1806_v30  ;;  %v687_v60 = vmul.f32 0.044715, %v1822_v53  ;;  %v1834_v3 = vadd.f32 %v1504_v17, %v657_v54 }
  0xf5   : > { %1614 = vtanh.f32 %v717_v55  ;;  %v718_v62 = vmul.f32 0.7978846, %v710_v56  ;;  %v697_v63 = vmul.f32 %v689_v57, %v1818_v48  ;;  %v690_v5 = vmul.f32 0.044715, %v1831_v0 }
  0xf6   : > { %1616 = vtanh.f32 %v715_v58  ;;  %v716_v1 = vmul.f32 0.7978846, %v708_v59  ;;  %v695_v2 = vmul.f32 %v687_v60, %v1822_v53  ;;  %v688_v8 = vmul.f32 0.044715, %v1834_v3 }
  0xf7   : > { %1618 = vtanh.f32 %v718_v62  ;;  %v705_v4 = vmul.f32 %v697_v63, %v1818_v48  ;;  %v698_v11 = vmul.f32 %v690_v5, %v1831_v0  ;;  %v771_v26 = vmul.f32 %v1846_v12, %v759_v15 }
  0xf8   : > { %1620 = vtanh.f32 %v716_v1  ;;  %v703_v7 = vmul.f32 %v695_v2, %v1822_v53  ;;  %v696_v14 = vmul.f32 %v688_v8, %v1834_v3  ;;  %v675_v40 = vmul.f32 0.5, %v1800_v25 }
  0xf9   : > { %v713_v10 = vadd.f32 %v705_v4, %v1818_v48  ;;  %v706_v18 = vmul.f32 %v698_v11, %v1831_v0  ;;  %v807_v43 = vadd.f32 %v799_v27, %v771_v26  ;;  %v678_v46 = vmul.f32 0.5, %v1803_v28 }
  0xfa   : > { %v711_v13 = vadd.f32 %v703_v7, %v1822_v53  ;;  %v704_v23 = vmul.f32 %v696_v14, %v1834_v3  ;;  %v676_v25 = vmul.f32 0.5, %v1806_v30  ;;  %v827_v51 = vmul.f32 %v1858_v33, %v815_v38 }
  0xfb   : > { %v721_v17 = vmul.f32 0.7978846, %v713_v10  ;;  %v714_v24 = vadd.f32 %v706_v18, %v1831_v0  ;;  %v1871_v54 = vrot.slane %v758_v42, %v797_v6  ;;  %v1873_v56 = vrot.slane %v757_v22, %v797_v6 }
  0xfc   : > { %v719_v21 = vmul.f32 0.7978846, %v711_v13  ;;  %v712_v29 = vadd.f32 %v704_v23, %v1834_v3  ;;  %v1876_v28 = vrot.slane %v757_v22, %v1828_v61  ;;  %v1878_v57 = vrot.slane %v757_v22, %v825_v20 }
  0xfd   : > { %1622 = vtanh.f32 %v721_v17  ;;  %v722_v32 = vmul.f32 0.7978846, %v714_v24  ;;  %v1881_v58 = vrot.slane %v758_v42, %v1828_v61  ;;  %v681_v59 = vmul.f32 0.5, %v1818_v48 }
  0xfe   : > { %1624 = vtanh.f32 %v719_v21  ;;  %v720_v37 = vmul.f32 0.7978846, %v712_v29  ;;  %v679_v60 = vmul.f32 0.5, %v1822_v53  ;;  %v835_v62 = vadd.f32 %v827_v51, %v807_v43 }
  0xff   : > { %v1615_v31 = vpop.eup %1614  ;;  %1626 = vtanh.f32 %v722_v32  ;;  %v1885_v63 = vrot.slane %v758_v42, %v825_v20  ;;  %v682_v4 = vmul.f32 0.5, %v1831_v0  ;;  %v680_v5 = vmul.f32 0.5, %v1834_v3 }
 0x100   : > { %v1617_v34 = vpop.eup %1616  ;;  %v733_v36 = vadd.f32 1.0, %v1615_v31  ;;  %1628 = vtanh.f32 %v720_v37 }
 0x101   : > { %v1619_v39 = vpop.eup %1618  ;;  %v731_v41 = vadd.f32 1.0, %v1617_v34 }
 0x102   : > { %v1621_v44 = vpop.eup %1620  ;;  %v741_v45 = vmul.f32 %v733_v36, %v677_v35  ;;  %v734_v47 = vadd.f32 1.0, %v1619_v39 }
 0x103   : > { %v739_v49 = vmul.f32 %v731_v41, %v675_v40  ;;  %v732_v50 = vadd.f32 1.0, %v1621_v44 }
 0x104   : > { %750 = vst [vmem:[#allocation2 + $0x31] sm:$0xff] %v741_v45  ;;  %v742_v52 = vmul.f32 %v734_v47, %v678_v46  ;;  %v1890_v6 = vmul.f32 %v1871_v54, %v741_v45  ;;  %v802_v8 = vmul.f32 %v1851_v19, %v741_v45  ;;  %v1895_v48 = vmul.f32 %v1873_v56, %v741_v45 }
 0x105   : > { %748 = vst [vmem:[#allocation2 + $0x11] sm:$0xff] %v739_v49  ;;  %v740_v55 = vmul.f32 %v732_v50, %v676_v25  ;;  %v800_v7 = vmul.f32 %v1851_v19, %v739_v49  ;;  %v883_v9 = vmul.f32 %v1873_v56, %v739_v49 }
 0x106   : > { %751 = vst [vmem:[#allocation2 + $0x41] sm:$0xff] %v742_v52  ;;  %v1901_v10 = vmul.f32 %v1873_v56, %v742_v52  ;;  %v1904_v0 = vmul.f32 %v1871_v54, %v742_v52  ;;  %v1911_v17 = vmul.f32 %v1851_v19, %v742_v52 }
 0x107   : > { %v1623_v30 = vpop.eup %1622  ;;  %749 = vst [vmem:[#allocation2 + $0x21] sm:$0xff] %v740_v55  ;;  %v884_v13 = vmul.f32 %v1873_v56, %v740_v55  ;;  %v968_v15 = vmul.f32 %v1871_v54, %v740_v55  ;;  %v801_v27 = vmul.f32 %v1851_v19, %v740_v55 }
 0x108   : > { %v1625_v1 = vpop.eup %1624  ;;  %v737_v2 = vadd.f32 1.0, %v1623_v30 }
 0x109   : > { %v735_v61 = vadd.f32 1.0, %v1625_v1  ;;  %v1627_v3 = vpop.eup %1626 }
 0x10a   : > { %v1897_v53 = vmul.f32 %v737_v2, %v681_v59  ;;  %v1629_v18 = vpop.eup %1628  ;;  %v738_v20 = vadd.f32 1.0, %v1627_v3 }
 0x10b   : > { %v1906_v11 = vmul.f32 %v735_v61, %v679_v60  ;;  %v929_v14 = vld [vmem:[#allocation2 + $0x30] sm:$0xff]  ;;  %v736_v29 = vadd.f32 1.0, %v1629_v18 }
 0x10c   : > { %v985_v16 = vld [vmem:[#allocation2 + $0x32] sm:$0xff]  ;;  %754 = vst [vmem:[#allocation2 + $0x71] sm:$0xff] %v1897_v53  ;;  %v941_v24 = vmul.f32 %v1881_v58, %v929_v14  ;;  %v774_v26 = vmul.f32 %v929_v14, %v1846_v12  ;;  %v1923_v35 = vmul.f32 %v738_v20, %v682_v4  ;;  %v857_v60 = vmul.f32 %v929_v14, %v1876_v28 }
 0x10d   : > { %v760_v21 = vld [vmem:[#allocation2 + $0x10] sm:$0xff]  ;;  %752 = vst [vmem:[#allocation2 + $0x51] sm:$0xff] %v1906_v11  ;;  %v1921_v34 = vmul.f32 %v1885_v63, %v985_v16  ;;  %v1927_v41 = vmul.f32 %v736_v29, %v680_v5  ;;  %v830_v44 = vmul.f32 %v985_v16, %v1858_v33  ;;  %v846_v45 = vld [vmem:[#allocation2 + $0x40] sm:$0xff]  ;;  %v913_v4 = vmul.f32 %v985_v16, %v1878_v57 }
 0x10e   : > { %v816_v23 = vld [vmem:[#allocation2 + $0x12] sm:$0xff]  ;;  %v772_v31 = vmul.f32 %v1846_v12, %v760_v21  ;;  %v855_v32 = vmul.f32 %v1876_v28, %v760_v21  ;;  %v844_v37 = vld [vmem:[#allocation2 + $0x20] sm:$0xff]  ;;  %v810_v40 = vadd.f32 %v802_v8, %v774_v26  ;;  %755 = vst [vmem:[#allocation2 + $0x81] sm:$0xff] %v1923_v35  ;;  %v971_v3 = vmul.f32 %v1871_v54, %v1906_v11 }
 0x10f   : > { %v828_v36 = vmul.f32 %v1858_v33, %v816_v23  ;;  %v900_v38 = vld [vmem:[#allocation2 + $0x22] sm:$0xff]  ;;  %v911_v39 = vmul.f32 %v1878_v57, %v816_v23  ;;  %v856_v46 = vmul.f32 %v1876_v28, %v844_v37  ;;  %v940_v22 = vmul.f32 %v1881_v58, %v844_v37  ;;  %753 = vst [vmem:[#allocation2 + $0x61] sm:$0xff] %v1927_v41 }
 0x110   : > { %v808_v42 = vadd.f32 %v800_v7, %v772_v31  ;;  %v863_v43 = vadd.f32 %v855_v32, %v835_v62  ;;  %v912_v47 = vmul.f32 %v1878_v57, %v900_v38  ;;  %v773_v49 = vmul.f32 %v844_v37, %v1846_v12  ;;  %v902_v25 = vld [vmem:[#allocation2 + $0x42] sm:$0xff]  ;;  %v1956_v37 = vld [vmem:[%s2127_s5] ss:$0 sm:$0xff] }
 0x111   : > { %v996_v52 = vmul.f32 %v1885_v63, %v900_v38  ;;  %v838_v55 = vadd.f32 %v830_v44, %v810_v40  ;;  %v829_v59 = vmul.f32 %v900_v38, %v1858_v33  ;;  %v858_v62 = vmul.f32 %v1876_v28, %v846_v45 }
 0x112   : > { %v836_v50 = vadd.f32 %v828_v36, %v808_v42  ;;  %v891_v51 = vadd.f32 %v883_v9, %v863_v43  ;;  %v809_v30 = vadd.f32 %v801_v27, %v773_v49  ;;  %v914_v5 = vmul.f32 %v1878_v57, %v902_v25 }
 0x113   : > { %v866_v7 = vadd.f32 %v858_v62, %v838_v55  ;;  %v942_v9 = vmul.f32 %v1881_v58, %v846_v45  ;;  %v998_v23 = vmul.f32 %v1885_v63, %v902_v25  ;;  %v775_v27 = vmul.f32 %v846_v45, %v1846_v12 }
 0x114   : > { %v864_v1 = vadd.f32 %v856_v46, %v836_v50  ;;  %v919_v2 = vadd.f32 %v911_v39, %v891_v51  ;;  %v837_v61 = vadd.f32 %v829_v59, %v809_v30  ;;  %v931_v8 = vld [vmem:[#allocation2 + $0x50] sm:$0xff]  ;;  %v804_v36 = vmul.f32 %v1851_v19, %v1906_v11  ;;  %v1967_v46 = vld [vmem:[%s2128_s6] ss:$0 sm:$0xff] }
 0x115   : > { %v943_v14 = vmul.f32 %v1881_v58, %v931_v8  ;;  %v987_v21 = vld [vmem:[#allocation2 + $0x52] sm:$0xff]  ;;  %v894_v16 = vadd.f32 %v1901_v10, %v866_v7  ;;  %v776_v29 = vmul.f32 %v931_v8, %v1846_v12  ;;  %v811_v10 = vadd.f32 %v1911_v17, %v775_v27 }
 0x116   : > { %v892_v18 = vadd.f32 %v884_v13, %v864_v1  ;;  %v948_v20 = vadd.f32 %v940_v22, %v919_v2  ;;  %v865_v26 = vadd.f32 %v857_v60, %v837_v61  ;;  %v831_v13 = vmul.f32 %v902_v25, %v1858_v33  ;;  %v1961_v42 = vld [vmem:[#allocation2 + $0x60] sm:$0xff]  ;;  %v1984_v7 = vld [vmem:[#allocation2 + $0x70] sm:$0xff] }
 0x117   : > { %v922_v39 = vadd.f32 %v914_v5, %v894_v16  ;;  %v832_v40 = vmul.f32 %v987_v21, %v1858_v33  ;;  %v812_v44 = vadd.f32 %v804_v36, %v776_v29  ;;  %v859_v45 = vmul.f32 %v931_v8, %v1876_v28  ;;  %v904_v59 = vld [vmem:[#allocation2 + $0x62] sm:$0xff] }
 0x118   : > { %v920_v31 = vadd.f32 %v912_v47, %v892_v18  ;;  %v976_v32 = vadd.f32 %v968_v15, %v948_v20  ;;  %v893_v38 = vadd.f32 %v1895_v48, %v865_v26  ;;  %v999_v48 = vmul.f32 %v1885_v63, %v987_v21 }
 0x119   : > { %v951_v22 = vadd.f32 %v943_v14, %v922_v39  ;;  %v839_v49 = vadd.f32 %v831_v13, %v811_v10  ;;  %v840_v50 = vadd.f32 %v832_v40, %v812_v44  ;;  %v887_v30 = vmul.f32 %v1873_v56, %v1906_v11  ;;  %v989_v40 = vld [vmem:[#allocation2 + $0x72] sm:$0xff] }
 0x11a   : > { %v949_v15 = vadd.f32 %v941_v24, %v920_v31  ;;  %v1004_v43 = vadd.f32 %v996_v52, %v976_v32  ;;  %v921_v47 = vadd.f32 %v913_v4, %v893_v38  ;;  %v860_v24 = vmul.f32 %v1876_v28, %v1961_v42 }
 0x11b   : > { %v979_v52 = vadd.f32 %v971_v3, %v951_v22  ;;  %v867_v55 = vadd.f32 %v859_v45, %v839_v49  ;;  %v915_v61 = vmul.f32 %v987_v21, %v1878_v57  ;;  %v945_v16 = vmul.f32 %v1881_v58, %v1984_v7 }
 0x11c   : > { %v977_v17 = vadd.f32 %v1890_v6, %v949_v15  ;;  %v1019_v25 = vmul.f32 %v1956_v37, %v1004_v43  ;;  %v950_v51 = vadd.f32 %v942_v9, %v921_v47  ;;  %v868_v1 = vadd.f32 %v860_v24, %v840_v50 }
 0x11d   : > { %v888_v6 = vmul.f32 %v1873_v56, %v1927_v41  ;;  %v1007_v4 = vadd.f32 %v999_v48, %v979_v52  ;;  %v895_v5 = vadd.f32 %v887_v30, %v867_v55  ;;  %v916_v9 = vmul.f32 %v1878_v57, %v904_v59 }
 0x11e   : > { %v1005_v60 = vadd.f32 %v1921_v34, %v977_v17  ;;  %v1978_v62 = vadd.f32 %v1967_v46, %v1019_v25  ;;  %v978_v2 = vadd.f32 %v1904_v0, %v950_v51  ;;  %v944_v0 = vmul.f32 %v1881_v58, %v1961_v42 }
 0x11f   : > { %v896_v34 = vadd.f32 %v888_v6, %v868_v1  ;;  %v1022_v18 = vmul.f32 %v1956_v37, %v1007_v4  ;;  %v923_v20 = vadd.f32 %v915_v61, %v895_v5  ;;  %v972_v13 = vmul.f32 %v1871_v54, %v1927_v41 }
 0x120   : > { %v1020_v11 = vmul.f32 %v1956_v37, %v1005_v60  ;;  %v1050_v8 = vmul.f32 0.044715, %v1978_v62  ;;  %v1006_v3 = vadd.f32 %v998_v23, %v978_v2  ;;  %v973_v10 = vmul.f32 %v1871_v54, %v1897_v53 }
 0x121   : > { %v924_v26 = vadd.f32 %v916_v9, %v896_v34  ;;  %v2000_v29 = vadd.f32 %v1967_v46, %v1022_v18  ;;  %v952_v23 = vadd.f32 %v944_v0, %v923_v20  ;;  %v1000_v45 = vmul.f32 %v1885_v63, %v904_v59 }
 0x122   : > { %v1993_v14 = vadd.f32 %v1967_v46, %v1020_v11  ;;  %v1058_v21 = vmul.f32 %v1050_v8, %v1978_v62  ;;  %v1021_v27 = vmul.f32 %v1956_v37, %v1006_v3  ;;  %v1001_v25 = vmul.f32 %v1885_v63, %v989_v40 }
 0x123   : > { %v953_v36 = vadd.f32 %v945_v16, %v924_v26  ;;  %v1053_v39 = vmul.f32 0.044715, %v2000_v29  ;;  %v980_v44 = vadd.f32 %v972_v13, %v952_v23  ;;  %v777_v52 = vmul.f32 %v1961_v42, %v1846_v12  ;;  %v906_v13 = vld [vmem:[#allocation2 + $0x82] sm:$0xff] }
 0x124   : > { %v1051_v31 = vmul.f32 0.044715, %v1993_v14  ;;  %v1066_v32 = vmul.f32 %v1058_v21, %v1978_v62  ;;  %v2007_v38 = vadd.f32 %v1967_v46, %v1021_v27  ;;  %v778_v55 = vmul.f32 %v1984_v7, %v1846_v12 }
 0x125   : > { %v1061_v22 = vmul.f32 %v1053_v39, %v2000_v29  ;;  %v981_v48 = vadd.f32 %v973_v10, %v953_v36  ;;  %v1008_v50 = vadd.f32 %v1000_v45, %v980_v44  ;;  %v805_v4 = vmul.f32 %v1851_v19, %v1927_v41  ;;  %v935_v39 = vld [vmem:[#allocation2 + $0x90] sm:$0xff] }
 0x126   : > { %v1059_v15 = vmul.f32 %v1051_v31, %v1993_v14  ;;  %v1074_v43 = vadd.f32 %v1066_v32, %v1978_v62  ;;  %v1052_v47 = vmul.f32 0.044715, %v2007_v38  ;;  %v806_v5 = vmul.f32 %v1851_v19, %v1897_v53  ;;  %v850_v19 = vld [vmem:[#allocation2 + $0x80] sm:$0xff] }
 0x127   : > { %v1069_v51 = vmul.f32 %v1061_v22, %v2000_v29  ;;  %v1009_v60 = vadd.f32 %v1001_v25, %v981_v48  ;;  %v1023_v1 = vmul.f32 %v1956_v37, %v1008_v50  ;;  %v833_v11 = vmul.f32 %v904_v59, %v1858_v33  ;;  %v991_v22 = vld [vmem:[#allocation2 + $0x92] sm:$0xff] }
 0x128   : > { %v1067_v49 = vmul.f32 %v1059_v15, %v1993_v14  ;;  %v1082_v17 = vmul.f32 0.7978846, %v1074_v43  ;;  %v1060_v24 = vmul.f32 %v1052_v47, %v2007_v38  ;;  %v813_v9 = vadd.f32 %v805_v4, %v777_v52  ;;  %v963_v47 = vld [vmem:[#allocation2 + $0x91] sm:$0xff] }
 0x129   : > { %v1077_v2 = vadd.f32 %v1069_v51, %v2000_v29  ;;  %v1024_v61 = vmul.f32 %v1956_v37, %v1009_v60  ;;  %v2035_v12 = vadd.f32 %v1967_v46, %v1023_v1  ;;  %v814_v3 = vadd.f32 %v806_v5, %v778_v55 }
 0x12a   : > { %v1075_v30 = vadd.f32 %v1067_v49, %v1993_v14  ;;  %1630 = vtanh.f32 %v1082_v17  ;;  %v1068_v6 = vmul.f32 %v1060_v24, %v2007_v38  ;;  %v834_v0 = vmul.f32 %v989_v40, %v1858_v33 }
 0x12b   : > { %v1085_v34 = vmul.f32 0.7978846, %v1077_v2  ;;  %v2040_v18 = vadd.f32 %v1967_v46, %v1024_v61  ;;  %v1054_v41 = vmul.f32 0.044715, %v2035_v12  ;;  %v841_v21 = vadd.f32 %v833_v11, %v813_v9 }
 0x12c   : > { %v1083_v42 = vmul.f32 0.7978846, %v1075_v30  ;;  %v1076_v8 = vadd.f32 %v1068_v6, %v2007_v38  ;;  %v861_v16 = vmul.f32 %v1984_v7, %v1876_v28  ;;  %v842_v27 = vadd.f32 %v834_v0, %v814_v3 }
 0x12d   : > { %v1055_v26 = vmul.f32 0.044715, %v2040_v18  ;;  %v1062_v59 = vmul.f32 %v1054_v41, %v2035_v12  ;;  %v862_v23 = vmul.f32 %v1876_v28, %v850_v19  ;;  %v889_v33 = vmul.f32 %v1873_v56, %v1897_v53 }
 0x12e   : > { %1632 = vtanh.f32 %v1083_v42  ;;  %v1084_v20 = vmul.f32 0.7978846, %v1076_v8  ;;  %v869_v36 = vadd.f32 %v861_v16, %v841_v21  ;;  %v890_v15 = vmul.f32 %v1873_v56, %v1923_v35 }
 0x12f   : > { %1634 = vtanh.f32 %v1085_v34  ;;  %v1063_v31 = vmul.f32 %v1055_v26, %v2040_v18  ;;  %v1070_v32 = vmul.f32 %v1062_v59, %v2035_v12  ;;  %v870_v10 = vadd.f32 %v862_v23, %v842_v27 }
 0x130   : > { %1636 = vtanh.f32 %v1084_v20  ;;  %v897_v28 = vadd.f32 %v889_v33, %v869_v36  ;;  %v917_v45 = vmul.f32 %v989_v40, %v1878_v57  ;;  %v918_v49 = vmul.f32 %v1878_v57, %v906_v13 }
 0x131   : > { %v1071_v7 = vmul.f32 %v1063_v31, %v2040_v18  ;;  %v1078_v44 = vadd.f32 %v1070_v32, %v2035_v12  ;;  %v898_v48 = vadd.f32 %v890_v15, %v870_v10  ;;  %v947_v53 = vmul.f32 %v1881_v58, %v935_v39 }
 0x132   : > { %v925_v50 = vadd.f32 %v917_v45, %v897_v28  ;;  %v946_v56 = vmul.f32 %v1881_v58, %v850_v19  ;;  %v975_v52 = vmul.f32 %v1871_v54, %v963_v47  ;;  %v1003_v55 = vmul.f32 %v1885_v63, %v991_v22 }
 0x133   : > { %v1079_v17 = vadd.f32 %v1071_v7, %v2040_v18  ;;  %v1086_v25 = vmul.f32 0.7978846, %v1078_v44  ;;  %v926_v51 = vadd.f32 %v918_v49, %v898_v48  ;;  %v974_v57 = vmul.f32 %v1871_v54, %v1923_v35 }
 0x134   : > { %v1631_v43 = vpop.eup %1630  ;;  %v954_v60 = vadd.f32 %v946_v56, %v925_v50  ;;  %v1042_v6 = vmul.f32 0.5, %v1978_v62  ;;  %v1043_v2 = vmul.f32 0.5, %v1993_v14  ;;  %v1002_v61 = vmul.f32 %v1885_v63, %v906_v13  ;;  %v1114_v50 = vld [vmem:[#allocation3] sm:$0xff] }
 0x135   : > { %v1098_v24 = vadd.f32 1.0, %v1631_v43  ;;  %v1087_v30 = vmul.f32 0.7978846, %v1079_v17  ;;  %1638 = vtanh.f32 %v1086_v25  ;;  %v955_v58 = vadd.f32 %v947_v53, %v926_v51  ;;  %v1116_v25 = vld [vmem:[#allocation3 + $0x10] sm:$0xff] }
 0x136   : > { %v982_v42 = vadd.f32 %v974_v57, %v954_v60  ;;  %v1044_v3 = vmul.f32 0.5, %v2007_v38  ;;  %v1045_v54 = vmul.f32 0.5, %v2000_v29  ;;  %v1046_v32 = vmul.f32 0.5, %v2035_v12 }
 0x137   : > { %1640 = vtanh.f32 %v1087_v30  ;;  %v1106_v8 = vmul.f32 %v1098_v24, %v1042_v6  ;;  %v983_v9 = vadd.f32 %v975_v52, %v955_v58  ;;  %v1047_v36 = vmul.f32 0.5, %v2040_v18  ;;  %v1117_v24 = vld [vmem:[#allocation3 + $0x18] sm:$0xff]  ;;  %v1515_v6 = vld [vmem:[%s2130_s8] ss:$0 sm:$0xff] }
 0x138   : > { %v1633_v40 = vpop.eup %1632  ;;  %v1010_v41 = vadd.f32 %v1002_v61, %v982_v42 }
 0x139   : > { %v1635_v1 = vpop.eup %1634  ;;  %v1099_v4 = vadd.f32 1.0, %v1633_v40  ;;  %v1011_v19 = vadd.f32 %v1003_v55, %v983_v9  ;;  %v1115_v55 = vld [vmem:[#allocation3 + $0x8] sm:$0xff] }
 0x13a   : > { %v1101_v5 = vadd.f32 1.0, %v1635_v1  ;;  %v1637_v11 = vpop.eup %1636  ;;  %v1025_v0 = vmul.f32 %v1956_v37, %v1010_v41  ;;  %v1120_v41 = vld [vmem:[#allocation3 + $0x30] sm:$0xff] }
 0x13b   : > { %v1107_v34 = vmul.f32 %v1099_v4, %v1043_v2  ;;  %v1100_v35 = vadd.f32 1.0, %v1637_v11  ;;  %v1026_v21 = vmul.f32 %v1956_v37, %v1011_v19  ;;  %v1516_v4 = vld [vmem:[%s2131_s9] ss:$0 sm:$0xff] }
 0x13c   : > { %v1109_v20 = vmul.f32 %v1101_v5, %v1045_v54  ;;  %v1040_v26 = vadd.f32 %v1967_v46, %v1025_v0 }
 0x13d   : > { %v1122_v62 = vpack.c.bf16 %v1107_v34, %v1106_v8  ;;  %v1108_v14 = vmul.f32 %v1100_v35, %v1044_v3  ;;  %v1041_v59 = vadd.f32 %v1967_v46, %v1026_v21  ;;  %v1119_v21 = vld [vmem:[#allocation3 + $0x28] sm:$0xff] }
 0x13e   : > { %v1056_v38 = vmul.f32 0.044715, %v1040_v26  ;;  %v1048_v22 = vmul.f32 0.5, %v1040_v26 }
 0x13f   : > { %1567 = vmatprep.mubr.bf16.mxu1 %v1122_v62  ;;  %v1123_v63 = vpack.c.bf16 %v1109_v20, %v1108_v14  ;;  %v1639_v16 = vpop.eup %1638  ;;  %v1057_v27 = vmul.f32 0.044715, %v1041_v59  ;;  %v1049_v48 = vmul.f32 0.5, %v1041_v59  ;;  %v1118_v62 = vld [vmem:[#allocation3 + $0x20] sm:$0xff]  ;;  %v1121_v14 = vld [vmem:[#allocation3 + $0x38] sm:$0xff] }
 0x140   : > { %v1102_v29 = vadd.f32 1.0, %v1639_v16  ;;  %v1064_v31 = vmul.f32 %v1056_v38, %v1040_v26 }
 0x141   : > { %1568 = vmatmul.mubr.bf16.vlgmr.msra.gmra.mrb[0].mxu1 %v1123_v63  ;;  %v1641_v23 = vpop.eup %1640  ;;  %v1065_v13 = vmul.f32 %v1057_v27, %v1041_v59 }
 0x142   : > { %v1103_v33 = vadd.f32 1.0, %v1641_v23  ;;  %v1072_v39 = vmul.f32 %v1064_v31, %v1040_v26  ;;  %v1110_v37 = vmul.f32 %v1102_v29, %v1046_v32 }
 0x143   : > { %v1073_v15 = vmul.f32 %v1065_v13, %v1041_v59 }
 0x144   : > { %v1111_v10 = vmul.f32 %v1103_v33, %v1047_v36  ;;  %v1080_v43 = vadd.f32 %v1072_v39, %v1040_v26 }
 0x145   : > { %v1081_v46 = vadd.f32 %v1073_v15, %v1041_v59 }
 0x146   : > { %v1124_v7 = vpack.c.bf16 %v1111_v10, %v1110_v37  ;;  %v1088_v44 = vmul.f32 0.7978846, %v1080_v43 }
 0x147   : > { %v1089_v28 = vmul.f32 0.7978846, %v1081_v46 }
 0x148   : > { %1571 = vmatprep.mubr.bf16.mxu1 %v1124_v7  ;;  %1642 = vtanh.f32 %v1088_v44 }
 0x149   : > { %1644 = vtanh.f32 %v1089_v28 }
 0x152   : > { %v1643_v45 = vpop.eup %1642 }
 0x153   : > { %v1645_v47 = vpop.eup %1644  ;;  %v1104_v12 = vadd.f32 1.0, %v1643_v45 }
 0x154   : > { %v1105_v18 = vadd.f32 1.0, %v1645_v47 }
 0x155   : > { %v1112_v49 = vmul.f32 %v1104_v12, %v1048_v22 }
 0x156   : > { %v1113_v53 = vmul.f32 %v1105_v18, %v1049_v48 }
 0x158   : > { %v1125_v17 = vpack.c.bf16 %v1113_v53, %v1112_v49 }
 0x15a   : > { %1572 = vmatmul.mubr.bf16.gmra.mrb[4].mxu1 %v1125_v17 }
 0x214   : > { %v1569_v56 = vpop.f32.mrb[0].mxu1 }
 0x215   : > { %v1257_v51 = vadd.f32 %v1569_v56, %v1116_v25  ;;  %v1224_v52 = vpop.f32.mrb[1].mxu1 }
 0x216   : > { %v1255_v40 = vadd.f32 %v1224_v52, %v1114_v50  ;;  %v1570_v30 = vpop.f32.mrb[2].mxu1 }
 0x217   : > { %1265 = vst.msk [vmem:[#allocation3 + $0x10] sm:$0xff] %vm514_vm0, %v1257_v51  ;;  %v1258_v60 = vadd.f32 %v1570_v30, %v1117_v24  ;;  %v1227_v57 = vpop.f32.mrb[3].mxu1 }
 0x218   : > { %1263 = vst.msk [vmem:[#allocation3] sm:$0xff] %vm514_vm0, %v1255_v40  ;;  %v1256_v1 = vadd.f32 %v1227_v57, %v1115_v55 }
 0x219   : > { %1266 = vst.msk [vmem:[#allocation3 + $0x18] sm:$0xff] %vm514_vm0, %v1258_v60 }
 0x21a   : > { %1264 = vst.msk [vmem:[#allocation3 + $0x8] sm:$0xff] %vm514_vm0, %v1256_v1 }
 0x21e   : > { %v1276_v2 = vld [vmem:[#allocation3 + $0x10] sm:$0xff] }
 0x21f   : > { %v1291_v58 = vmul.f32 %v1515_v6, %v1276_v2  ;;  %v1274_v5 = vld [vmem:[#allocation3] sm:$0xff] }
 0x220   : > { %v1289_v42 = vmul.f32 %v1515_v6, %v1274_v5  ;;  %v1277_v61 = vld [vmem:[#allocation3 + $0x18] sm:$0xff] }
 0x221   : > { %v1306_v11 = vadd.f32 %v1516_v4, %v1291_v58  ;;  %v1292_v8 = vmul.f32 %v1515_v6, %v1277_v61  ;;  %v1275_v34 = vld [vmem:[#allocation3 + $0x8] sm:$0xff] }
 0x222   : > { %v1304_v9 = vadd.f32 %v1516_v4, %v1289_v42  ;;  %v1290_v3 = vmul.f32 %v1515_v6, %v1275_v34 }
 0x223   : > { %1314 = vst.msk [vmem:[%s2091_s30 + $0x10] sm:$0xff] %vm514_vm0, %v1306_v11  ;;  %v1307_v54 = vadd.f32 %v1516_v4, %v1292_v8 }
 0x224   : > { %1312 = vst.msk [vmem:[%s2091_s30] sm:$0xff] %vm514_vm0, %v1304_v9  ;;  %v1305_v35 = vadd.f32 %v1516_v4, %v1290_v3 }
 0x225   : > { %1315 = vst.msk [vmem:[%s2091_s30 + $0x18] sm:$0xff] %vm514_vm0, %v1307_v54 }
 0x226   : > { %1313 = vst.msk [vmem:[%s2091_s30 + $0x8] sm:$0xff] %vm514_vm0, %v1305_v35 }
 0x22d   : > { %v1573_v19 = vpop.f32.mrb[4].mxu1 }
 0x22e   : > { %v1261_v20 = vadd.f32 %v1573_v19, %v1120_v41  ;;  %v1240_v0 = vpop.f32.mrb[5].mxu1 }
 0x22f   : > { %v1259_v63 = vadd.f32 %v1240_v0, %v1118_v62  ;;  %v1574_v26 = vpop.f32.mrb[6].mxu1 }
 0x230   : > { %1269 = vst.msk [vmem:[#allocation3 + $0x30] sm:$0xff] %vm514_vm0, %v1261_v20  ;;  %v1262_v59 = vadd.f32 %v1574_v26, %v1121_v14  ;;  %v1243_v16 = vpop.f32.mrb[7].mxu1 }
 0x231   : > { %1267 = vst.msk [vmem:[#allocation3 + $0x20] sm:$0xff] %vm514_vm0, %v1259_v63  ;;  %v1260_v38 = vadd.f32 %v1243_v16, %v1119_v21 }
 0x232   : > { %1270 = vst.msk [vmem:[#allocation3 + $0x38] sm:$0xff] %vm514_vm0, %v1262_v59 }
 0x233   : > { %1268 = vst.msk [vmem:[#allocation3 + $0x28] sm:$0xff] %vm514_vm0, %v1260_v38 }
 0x237   : > { %v1280_v29 = vld [vmem:[#allocation3 + $0x30] sm:$0xff] }
 0x238   : > { %v1295_v27 = vmul.f32 %v1515_v6, %v1280_v29  ;;  %v1278_v23 = vld [vmem:[#allocation3 + $0x20] sm:$0xff] }
 0x239   : > { %v1293_v31 = vmul.f32 %v1515_v6, %v1278_v23  ;;  %v1281_v32 = vld [vmem:[#allocation3 + $0x38] sm:$0xff] }
 0x23a   : > { %v1310_v36 = vadd.f32 %v1516_v4, %v1295_v27  ;;  %v1296_v33 = vmul.f32 %v1515_v6, %v1281_v32  ;;  %v1279_v13 = vld [vmem:[#allocation3 + $0x28] sm:$0xff] }
 0x23b   : > { %v1308_v39 = vadd.f32 %v1516_v4, %v1293_v31  ;;  %v1294_v37 = vmul.f32 %v1515_v6, %v1279_v13 }
 0x23c   : > { %1318 = vst.msk [vmem:[%s2091_s30 + $0x30] sm:$0xff] %vm514_vm0, %v1310_v36  ;;  %v1311_v10 = vadd.f32 %v1516_v4, %v1296_v33 }
 0x23d   : > { %1316 = vst.msk [vmem:[%s2091_s30 + $0x20] sm:$0xff] %vm514_vm0, %v1308_v39  ;;  %v1309_v15 = vadd.f32 %v1516_v4, %v1294_v37 }
 0x23e   : > { %1319 = vst.msk [vmem:[%s2091_s30 + $0x38] sm:$0xff] %vm514_vm0, %v1311_v10 }
 0x23f   : > { %1317 = vst.msk [vmem:[%s2091_s30 + $0x28] sm:$0xff] %vm514_vm0, %v1309_v15 }
 0x240 PF: > { %s20_s15 = sadd.s32 1, %s1668_s15   ;;  %s2133_s13 = smov %s1664_s14 }
 0x241   : > { %p17_p5 = scmp.ge.s32.totalorder %s20_s15, 4   ;;  %s2134_s14 = smov %s2136_s16 }
 0x243   :  { %19 = sbr.rel (!%p17_p5) target bundleno = 2 (0x2), region = 122 }

</bundles_post_ra>
